<compile_context>
chip_gen: v6e
topology: v6e:2x2x1
jax: 0.10.0
libtpu: 0.0.40
codegen_flags: <defaults>
</compile_context>

<pallas_src>
import math

import jax
import jax.numpy as jnp
from jax import lax
from jax.experimental import pallas as pl
from jax.experimental.pallas import tpu as pltpu


def _make_mlp_kernel(chunk):
    """Kernel factory: `chunk` is the static number of batch lanes processed
    per inner-loop step (a multiple of 128 that divides the tile)."""

    def _mlp_kernel(x_ref, w1_ref, b1_ref, w2_ref, b2_ref, o_ref):
        # x_ref : (tb, 6)  batch-major input tile
        # o_ref : (1, tb)  lane-dense output tile (batch on lanes)
        w1 = w1_ref[...]          # (25, 6)
        b1 = b1_ref[...]          # (25, 1)  broadcasts over lanes
        w2 = w2_ref[...]          # (1, 25)
        b2 = b2_ref[...]          # (1, 1)

        tb = x_ref.shape[0]
        n_chunks = tb // chunk    # static

        @pl.loop(0, n_chunks)
        def _(c):
            off = pl.multiple_of(c * chunk, chunk)
            x_c = x_ref[pl.ds(off, chunk), :]                     # (chunk, 6)

            # Layer 1 on the MXU: w1 @ x_c^T -> (25, chunk); batch -> lanes,
            # no explicit transpose needed (NT dimension numbers).
            h = lax.dot_general(
                w1, x_c, (((1,), (1,)), ((), ())),
                preferred_element_type=jnp.float32)               # (25, chunk)
            h = jnp.maximum(h + b1, 0.0)

            # Layer 2 on the MXU: (1,25) @ (25,chunk) -> (1, chunk).
            y = jnp.dot(w2, h, preferred_element_type=jnp.float32) + b2
            y = jnp.maximum(y, 0.0)

            o_ref[:, pl.ds(off, chunk)] = y.astype(o_ref.dtype)

    return _mlp_kernel


def _round_up(x, m):
    return ((x + m - 1) // m) * m


def net_forward(x, w1, b1, w2, b2, *, tb=65536, chunk=8192):
    """Fused MLP forward.

    x : (B, 6) float32 (batch-major, as produced by the PyTorch module)
    w1: (25, 6), b1: (25,)   -- nn.Linear(6, 25) parameters
    w2: (1, 25), b2: (1,)    -- nn.Linear(25, 1) parameters
    tb   : batch tile per grid step (lane axis of the output), multiple of 128
    chunk: lanes processed per inner-loop step, multiple of 128, divides tb
    Returns (B, 1) float32.
    """
    B = x.shape[0]
    assert x.shape[1] == 6, "expected (B, 6) input"

    # Clamp the tile to the (lane-aligned) batch so tiny batches don't pay for
    # a huge padded tile; make the in-tile chunk divide the tile.
    tb = max(128, min(_round_up(tb, 128), _round_up(B, 128)))
    chunk = max(128, min(_round_up(chunk, 128), tb))
    chunk = math.gcd(tb, chunk)            # still a multiple of 128
    n_tiles = pl.cdiv(B, tb)

    x32 = x.astype(jnp.float32)                         # (B, 6), untouched
    w1_ = w1.astype(jnp.float32).reshape(25, 6)
    b1_ = b1.astype(jnp.float32).reshape(25, 1)
    w2_ = w2.astype(jnp.float32).reshape(1, 25)
    b2_ = b2.astype(jnp.float32).reshape(1, 1)

    flops = 2 * B * (25 * 6 + 25)
    bytes_accessed = 4 * (B * 6 + B + 25 * 6 + 25 + 25 + 1)

    y = pl.pallas_call(
        _make_mlp_kernel(chunk),
        out_shape=jax.ShapeDtypeStruct((1, B), jnp.float32),
        grid_spec=pltpu.PrefetchScalarGridSpec(
            num_scalar_prefetch=0,
            grid=(n_tiles,),
            in_specs=[
                pl.BlockSpec((tb, 6), lambda i: (i, 0)),   # x tile, batch-major
                pl.BlockSpec((25, 6), lambda i: (0, 0)),   # weights: VMEM-resident
                pl.BlockSpec((25, 1), lambda i: (0, 0)),
                pl.BlockSpec((1, 25), lambda i: (0, 0)),
                pl.BlockSpec((1, 1), lambda i: (0, 0)),
            ],
            out_specs=pl.BlockSpec((1, tb), lambda i: (0, i)),  # lane-dense out
        ),
        compiler_params=pltpu.CompilerParams(
            dimension_semantics=("parallel",),      # shard batch tiles across TCs
            vmem_limit_bytes=32 * 1024 * 1024,      # fits v5e/v6e/v7x budgets
        ),
        cost_estimate=pl.CostEstimate(
            flops=flops, transcendentals=0, bytes_accessed=bytes_accessed),
    )(x32, w1_, b1_, w2_, b2_)

    return y.reshape(B, 1)


def net_forward_ref(x, w1, b1, w2, b2):
    """Plain-JAX reference (also the right call for tiny batches)."""
    h = jnp.maximum(x @ w1.T + b1, 0.0)
    return jnp.maximum(h @ w2.T + b2, 0.0)


def init_params(key):
    """Deterministic init with PyTorch-native parameter shapes:
    linOne: weight (25, 6), bias (25,);  linTwo: weight (1, 25), bias (1,)."""
    k1, k2, k3, k4 = jax.random.split(key, 4)
    bound1 = 1.0 / jnp.sqrt(6.0)
    bound2 = 1.0 / jnp.sqrt(25.0)
    w1 = jax.random.uniform(k1, (25, 6), jnp.float32, -bound1, bound1)
    b1 = jax.random.uniform(k2, (25,), jnp.float32, -bound1, bound1)
    w2 = jax.random.uniform(k3, (1, 25), jnp.float32, -bound2, bound2)
    b2 = jax.random.uniform(k4, (1,), jnp.float32, -bound2, bound2)
    return w1, b1, w2, b2


if __name__ == "__main__":
    key = jax.random.PRNGKey(0)
    kx, kp = jax.random.split(key)

    # Small smoke test; the ragged batch exercises the masked last block.
    B = 1000
    x = jax.random.normal(kx, (B, 6), jnp.float32)
    w1, b1, w2, b2 = init_params(kp)

    ref = net_forward_ref(x, w1, b1, w2, b2)

    # Multi-tile grid + multi-step in-tile chunk loop + ragged last block.
    out_small = jax.block_until_ready(
        net_forward(x, w1, b1, w2, b2, tb=512, chunk=256))
    assert out_small.shape == (B, 1)
    assert jnp.allclose(out_small, ref, atol=1e-5, rtol=1e-5)

    # Default (large-tile) path: tile clamps to the small batch -> single tile.
    out_default = jax.block_until_ready(net_forward(x, w1, b1, w2, b2))
    assert out_default.shape == (B, 1)
    assert jnp.allclose(out_default, ref, atol=1e-5, rtol=1e-5)

    print("KERNEL_OK")
</pallas_src>

<mosaic_0001>
module attributes {stable_mosaic.version = 11 : i64} {
  func.func @_mlp_kernel(%arg0: i32, %arg1: memref<512x6xf32, #tpu.memory_space<vmem>>, %arg2: memref<25x6xf32, #tpu.memory_space<vmem>>, %arg3: memref<25x1xf32, #tpu.memory_space<vmem>>, %arg4: memref<1x25xf32, #tpu.memory_space<vmem>>, %arg5: memref<1x1xf32, #tpu.memory_space<vmem>>, %arg6: memref<1x512xf32, #tpu.memory_space<vmem>>) attributes {dimension_semantics = [#tpu.dimension_semantics<parallel>], iteration_bounds = array<i64: 2>, scalar_prefetch = 0 : i64, scratch_operands = 0 : i64, tpu.core_type = #tpu.core_type<tc>, window_params = [{transform_indices = @transform_0, window_bounds = array<i64: 512, 6>}, {pipeline_mode = #tpu.pipeline_mode<synchronous>, transform_indices = @transform_1, window_bounds = array<i64: 25, 6>}, {pipeline_mode = #tpu.pipeline_mode<synchronous>, transform_indices = @transform_2, window_bounds = array<i64: 25, 1>}, {pipeline_mode = #tpu.pipeline_mode<synchronous>, transform_indices = @transform_3, window_bounds = array<i64: 1, 25>}, {pipeline_mode = #tpu.pipeline_mode<synchronous>, transform_indices = @transform_4, window_bounds = array<i64: 1, 1>}, {transform_indices = @transform_5, window_bounds = array<i64: 1, 512>}]} {
    %c0 = arith.constant 0 : index
    %c0_0 = arith.constant 0 : index
    %0 = vector.load %arg2[%c0, %c0_0] : memref<25x6xf32, #tpu.memory_space<vmem>>, vector<25x6xf32>
    %c0_1 = arith.constant 0 : index
    %c0_2 = arith.constant 0 : index
    %1 = vector.load %arg3[%c0_1, %c0_2] : memref<25x1xf32, #tpu.memory_space<vmem>>, vector<25x1xf32>
    %c0_3 = arith.constant 0 : index
    %c0_4 = arith.constant 0 : index
    %2 = vector.load %arg4[%c0_3, %c0_4] : memref<1x25xf32, #tpu.memory_space<vmem>>, vector<1x25xf32>
    %c0_5 = arith.constant 0 : index
    %c0_6 = arith.constant 0 : index
    %3 = vector.load %arg5[%c0_5, %c0_6] : memref<1x1xf32, #tpu.memory_space<vmem>>, vector<1x1xf32>
    %c0_i32 = arith.constant 0 : i32
    %c2_i32 = arith.constant 2 : i32
    %4 = arith.addi %c0_i32, %c2_i32 : i32
    %c1_i32 = arith.constant 1 : i32
    scf.for %arg7 = %c0_i32 to %4 step %c1_i32  : i32 {
      %c1_i32_8 = arith.constant 1 : i32
      %5 = arith.muli %arg7, %c1_i32_8 : i32
      %c0_i32_9 = arith.constant 0 : i32
      %6 = arith.addi %c0_i32_9, %5 : i32
      %c256_i32 = arith.constant 256 : i32
      %7 = arith.muli %6, %c256_i32 : i32
      %8 = tpu.assume_multiple %7, 256 : i32
      %9 = arith.index_cast %8 : i32 to index
      %c0_10 = arith.constant 0 : index
      %10 = vector.load %arg1[%9, %c0_10] : memref<512x6xf32, #tpu.memory_space<vmem>>, vector<256x6xf32>
      %cst = arith.constant dense<0.000000e+00> : vector<25x256xf32>
      %11 = tpu.matmul %0, %10, %cst {dimension_numbers = #tpu.dot_dimension_numbers<[1], [1], [0], [0], [0, 0, 1, 0], [], []>} : vector<25x6xf32>, vector<256x6xf32>, vector<25x256xf32> -> vector<25x256xf32>
      %12 = vector.broadcast %1 : vector<25x1xf32> to vector<25x256xf32>
      %13 = arith.addf %11, %12 : vector<25x256xf32>
      %cst_11 = arith.constant 0.000000e+00 : f32
      %14 = vector.broadcast %cst_11 : f32 to vector<25x256xf32>
      %15 = arith.maximumf %13, %14 : vector<25x256xf32>
      %cst_12 = arith.constant dense<0.000000e+00> : vector<1x256xf32>
      %16 = tpu.matmul %2, %15, %cst_12 {dimension_numbers = #tpu.dot_dimension_numbers<[1], [0], [0], [1], [0, 0, 1, 1], [], []>} : vector<1x25xf32>, vector<25x256xf32>, vector<1x256xf32> -> vector<1x256xf32>
      %17 = vector.broadcast %3 : vector<1x1xf32> to vector<1x256xf32>
      %18 = arith.addf %16, %17 : vector<1x256xf32>
      %cst_13 = arith.constant 0.000000e+00 : f32
      %19 = vector.broadcast %cst_13 : f32 to vector<1x256xf32>
      %20 = arith.maximumf %18, %19 : vector<1x256xf32>
      %c0_14 = arith.constant 0 : index
      %21 = arith.index_cast %8 : i32 to index
      %22 = vector.load %arg6[%c0_14, %21] : memref<1x512xf32, #tpu.memory_space<vmem>>, vector<1x256xf32>
      tpu.vector_store %arg6[%c0_14, %21], %20 {strides = array<i32>} : memref<1x512xf32, #tpu.memory_space<vmem>>, vector<1x256xf32>,
    }
    %c2_i32_7 = arith.constant 2 : i32
    return
  }
  func.func @transform_0(%arg0: i32) -> (i32, i32) {
    %c0_i32 = arith.constant 0 : i32
    %c0_i32_0 = arith.constant 0 : i32
    return %arg0, %c0_i32 : i32, i32
  }
  func.func @transform_1(%arg0: i32) -> (i32, i32) {
    %c0_i32 = arith.constant 0 : i32
    %c0_i32_0 = arith.constant 0 : i32
    %c0_i32_1 = arith.constant 0 : i32
    return %c0_i32, %c0_i32_0 : i32, i32
  }
  func.func @transform_2(%arg0: i32) -> (i32, i32) {
    %c0_i32 = arith.constant 0 : i32
    %c0_i32_0 = arith.constant 0 : i32
    %c0_i32_1 = arith.constant 0 : i32
    return %c0_i32, %c0_i32_0 : i32, i32
  }
  func.func @transform_3(%arg0: i32) -> (i32, i32) {
    %c0_i32 = arith.constant 0 : i32
    %c0_i32_0 = arith.constant 0 : i32
    %c0_i32_1 = arith.constant 0 : i32
    return %c0_i32, %c0_i32_0 : i32, i32
  }
  func.func @transform_4(%arg0: i32) -> (i32, i32) {
    %c0_i32 = arith.constant 0 : i32
    %c0_i32_0 = arith.constant 0 : i32
    %c0_i32_1 = arith.constant 0 : i32
    return %c0_i32, %c0_i32_0 : i32, i32
  }
  func.func @transform_5(%arg0: i32) -> (i32, i32) {
    %c0_i32 = arith.constant 0 : i32
    %c0_i32_0 = arith.constant 0 : i32
    return %c0_i32, %arg0 : i32, i32
  }
}

</mosaic_0001>

<bundles_post_ra>
// kernel: tpu_custom_call.1
= control target key start
LH: loop header
LB: loop body
LE: loop exit
PB: predicated region body
PF: predicated region fallthrough
CT: control target
= control target key end

     0   :  { %s1225_s0 = inlined_call_operand.vmem [shape: f32[1000,6], index: 0, kind: input, shape index: {}]   ;;  %s1226_s1 = inlined_call_operand.vmem [shape: f32[25,6], index: 1, kind: input, shape index: {}]   ;;  %s1227_s2 = inlined_call_operand.vmem [shape: f32[25,1], index: 2, kind: input, shape index: {}]   ;;  %s1228_s3 = inlined_call_operand.vmem [shape: f32[1,25], index: 3, kind: input, shape index: {}]   ;;  %s1229_s4 = inlined_call_operand.<no memory space> [shape: f32[1,1], index: 4, kind: input, shape index: {}]   ;;  %s1230_s5 = inlined_call_operand.hbm [shape: f32[1,1000], index: 5, kind: output, shape index: {}]  }
   0x1   :  { %v10_v0 = vstv %s1229_s4 }
   0x2   :  { %11 = vst [vmem:[#allocation2] sm:$0x1] %v10_v0 }
   0x3   :  { %12 = vsyncpa [#allocation4], 0 }
   0x4   :  { %14 = vsyncpa [#allocation4 + $0x1], 0  ;;  %s977_s20 = smov 0   ;;  %s979_s21 = smov 0  }
   0x5   :  { %s981_s22 = smov 0   ;;  %s983_s23 = smov 0  }
   0x6 LB: > { %s724_s4 = sadd.s32 4294967295, %s934_s23   ;;  %s725_s24 = sadd.s32 4294967294, %s934_s23   ;;  %s934_s23 = sphi %s983_s23, %s1236_s23   ;;  %s930_s22 = sphi %s981_s22, %s1235_s22   ;;  %s926_s21 = sphi %s979_s21, %s1234_s21   ;;  %s922_s20 = sphi %s977_s20, %s1233_s20  }
   0x7   : > { %s1000_s25 = sadd.s32 1, %s934_s23   ;;  %s137_s26 = sadd.s32 1, %s930_s22 }
   0x8   : > { %s134_s27 = ssub.s32 %s934_s23, %s1000_s25  ;;  %p147_p0 = scmp.ne.s32.totalorder %s930_s22, %s926_s21 }
   0x9   : > { %p135_p1 = scmp.eq.s32.totalorder %s134_s27, 0  ;;  %p148_p2 = scmp.eq.s32.totalorder %s724_s4, 1 }
   0xa   : > { %p153_p3 = scmp.ne.s32.totalorder %s926_s21, %s922_s20  ;;  %p154_p4 = scmp.eq.s32.totalorder %s725_s24, 1 }
   0xb   : > { %s1010_s28 = scalar_select %p135_p1, %s930_s22, %s137_s26  }
   0xc   : > { %p1012_p5 = por %p148_p2, %p147_p0  ;;  %p1016_p6 = por %p154_p4, %p153_p3 }
   0xd   : > { %p728_p7 = scmp.ge.s32.totalorder %s934_s23, 1  ;;  %p201_p8 = scmp.lt.s32.totalorder %s934_s23, 3 }
   0xf   : > { %p202_p9 = pnand %p728_p7, %p201_p8 }
  0x10   : > { %s230_s6 = sand.u32 (!%p202_p9), 1, %s926_s21   ;;  %s1023_s7 = sshll.u32 (!%p202_p9), %s724_s4, 6 }
  0x11   : > { %205 = sbr.rel (%p202_p9) target bundleno = 530 (0x212), region = 40  ;;  %s1042_s14 = sshll.u32 (!%p202_p9), %s230_s6, 2 }
  0x12   : > { %p238_p10 = scmp.lt.s32.totalorder (!%p202_p9), %s1023_s7, 124  ;;  %s232_s17 = scalar_lea.vmem (!%p202_p9), [#allocation3], %s1042_s14 }
  0x13   : > { %s1084_s18 = smov (!%p202_p9), 0  }
  0x16   : > { %v1028_v1 = vld [vmem:[%s1226_s1] sm:$0xff]  ;;  %v1033_v2 = vld [vmem:[%s1226_s1 + $0x8] sm:$0xff]  ;;  %v1038_v3 = vld [vmem:[%s1226_s1 + $0x10] sm:$0xff]  ;;  %s239_s11 = scalar_select %p238_p10, %s1023_s7, 124 }
  0x17   : > { %v1048_v4 = vld [vmem:[%s1226_s1 + $0x18] sm:$0x1]  ;;  %v1053_v5 = vld [vmem:[%s1227_s2] sm:$0xff]  ;;  %v1058_v6 = vld [vmem:[%s1227_s2 + $0x8] sm:$0xff] }
  0x18   : > { %v1063_v7 = vld [vmem:[%s1227_s2 + $0x10] sm:$0xff]  ;;  %v1068_v8 = vld [vmem:[%s1227_s2 + $0x18] sm:$0x1]  ;;  %v1073_v9 = vld [vmem:[%s1228_s3] sm:$0x1]  ;;  %s731_s12 = sshll.u32 %s239_s11, 3 }
  0x19   : > { %v1076_v10 = vld [vmem:[#allocation2] sm:$0x1]  ;;  %s1081_s16 = scalar_lea.vmem %s1225_s0, %s731_s12 }
  0x1a LB: >> { %vm318_vm0 = vcmask 48128   ;;  %v940_v11 = vmov 0   ;;  %s732_s19 = sshll.u32 %s938_s18, 8  ;;  %v941_v44 = vmov 0.0   ;;  %vm537_vm1 = vcmask 1040384   ;;  %s263_s18 = sadd.s32 1, %s938_s18   ;;  %s938_s18 = sphi %s1084_s18, %s263_s18  }
  0x1b   : >> { %810 = vmatprep.mubr.msk.f32.mxu0 %vm318_vm0, %v1028_v1  ;;  %869 = vset.pattern.permute.xlu1 %v940_v11  ;;  %s1096_s4 = scalar_lea.vmem %s1081_s16, %s732_s19  ;;  %vm533_vm2 = vcmask 203776   ;;  %s635_s24 = sshra.s32 %s732_s19, 7 }
  0x1c   : >> { %305 = vperm.xlu1 %869, %v1058_v6   ;;  %868 = vset.pattern.permute.xlu0 %v940_v11  ;;  %v297_v12 = vld [vmem:[%s1096_s4 + $0xf8] sm:$0xff]  ;;  %v296_v14 = vld [vmem:[%s1096_s4 + $0xf0] sm:$0xff]  ;;  %v295_v16 = vld [vmem:[%s1096_s4 + $0xe8] sm:$0xff]  ;;  %s637_s26 = scalar_lea.vmem %s232_s17, %s635_s24 [#allocation3]  ;;  %p260_p11 = scmp.ge.s32.totalorder %s263_s18, 2  }
  0x1d   : >> { %315 = vperm.xlu0 %868, %v1068_v8   ;;  %v281_v13 = vld [vmem:[%s1096_s4 + $0x78] sm:$0xff]  ;;  %778 = vmatprep.subr.msk.mxu0 %vm318_vm0, %v297_v12  ;;  %v280_v15 = vld [vmem:[%s1096_s4 + $0x70] sm:$0xff]  ;;  %v279_v17 = vld [vmem:[%s1096_s4 + $0x68] sm:$0xff]  ;;  %s656_s9 = scalar_lea.hbm (%p260_p11), %s1230_s5, %s1023_s7  ;;  %s658_s10 = sshll.u32 (%p260_p11), %s232_s17, 4  ;;  %s659_s10 = int_to_ptr.vmem [resolvable:$true] %s658_s10 }
  0x1e   : >> { %779 = vmatpush3.xpose.msk.msra.mxu0 %vm318_vm0, %v281_v13  ;;  %v294_v18 = vld [vmem:[%s1096_s4 + $0xe0] sm:$0xff]  ;;  %v293_v20 = vld [vmem:[%s1096_s4 + $0xd8] sm:$0xff]  ;;  %v292_v22 = vld [vmem:[%s1096_s4 + $0xd0] sm:$0xff]  ;;  %608 = vmatprep.mubr.f32.mxu1 %v941_v44  ;;  %s644_s11 = scalar_lea.sflag (%p260_p11), [#allocation4], %s230_s6  ;;  %s870_s12 = scalar_lea.vmem (%p260_p11), %s659_s10, 64 }
  0x1f   : >> { %780 = vmatprep.subr.msk.mxu0 %vm318_vm0, %v296_v14  ;;  %v278_v19 = vld [vmem:[%s1096_s4 + $0x60] sm:$0xff]  ;;  %v277_v21 = vld [vmem:[%s1096_s4 + $0x58] sm:$0xff]  ;;  %v276_v23 = vld [vmem:[%s1096_s4 + $0x50] sm:$0xff]  ;;  %p871_p12 = scmp.ne.s32.totalorder (%p260_p11), %s659_s10, %s870_s12  ;;  %s943_s13 = smov (%p260_p11), [#allocation3]  }
  0x20   : >> { %300 = vperm.xlu1 %869, %v1053_v5   ;;  %v291_v24 = vld [vmem:[%s1096_s4 + $0xc8] sm:$0xff]  ;;  %v290_v26 = vld [vmem:[%s1096_s4 + $0xc0] sm:$0xff]  ;;  %v289_v28 = vld [vmem:[%s1096_s4 + $0xb8] sm:$0xff]  ;;  %s874_s15 = sshll.u32 (%p260_p11), %s943_s13, 4  ;;  %s875_s15 = int_to_ptr.vmem [resolvable:$false] %s874_s15 }
  0x21   : >> { %310 = vperm.xlu0 %868, %v1063_v7   ;;  %v275_v25 = vld [vmem:[%s1096_s4 + $0x48] sm:$0xff]  ;;  %v274_v27 = vld [vmem:[%s1096_s4 + $0x40] sm:$0xff]  ;;  %v273_v29 = vld [vmem:[%s1096_s4 + $0x38] sm:$0xff]  ;;  %p872_p13 = pnand (%p260_p11), %p871_p12, %p1012_p5  ;;  %s876_s16 = scalar_lea.vmem (%p260_p11), %s875_s15, 128 }
  0x22   : >> { %781 = vmatpush3.xpose.msk.msra.mxu0 %vm318_vm0, %v280_v15  ;;  %v288_v30 = vld [vmem:[%s1096_s4 + $0xb0] sm:$0xff]  ;;  %v287_v32 = vld [vmem:[%s1096_s4 + $0xa8] sm:$0xff]  ;;  %v286_v34 = vld [vmem:[%s1096_s4 + $0xa0] sm:$0xff]  ;;  %p877_p1 = scmp.lt.s32.totalorder (%p260_p11), %s659_s10, %s875_s15  ;;  %p878_p2 = scmp.lt.s32.totalorder (%p260_p11), %s876_s16, %s870_s12 }
  0x23   : >> { %782 = vmatprep.subr.msk.mxu0 %vm318_vm0, %v295_v16  ;;  %v272_v31 = vld [vmem:[%s1096_s4 + $0x30] sm:$0xff]  ;;  %v271_v33 = vld [vmem:[%s1096_s4 + $0x28] sm:$0xff]  ;;  %v270_v35 = vld [vmem:[%s1096_s4 + $0x20] sm:$0xff]  ;;  %p873_p0 = pneg (%p260_p11), %p872_p13 }
  0x24   : >> { %v285_v36 = vld [vmem:[%s1096_s4 + $0x98] sm:$0xff]  ;;  %v284_v38 = vld [vmem:[%s1096_s4 + $0x90] sm:$0xff]  ;;  %v283_v40 = vld [vmem:[%s1096_s4 + $0x88] sm:$0xff]  ;;  %p879_p3 = por (%p260_p11), %p878_p2, %p877_p1 }
  0x25   : >> { %526 = vperm.xlu0 %868, %v1076_v10   ;;  %v269_v37 = vld [vmem:[%s1096_s4 + $0x18] sm:$0xff]  ;;  %v268_v39 = vld [vmem:[%s1096_s4 + $0x10] sm:$0xff]  ;;  %v267_v41 = vld [vmem:[%s1096_s4 + $0x8] sm:$0xff] }
  0x26   : >> { %783 = vmatpush3.xpose.msk.msra.mxu0 %vm318_vm0, %v279_v17  ;;  %v282_v42 = vld [vmem:[%s1096_s4 + $0x80] sm:$0xff]  ;;  %p880_p4 = pnand (%p260_p11), %p879_p3, %p873_p0 }
  0x27   : >> { %784 = vmatprep.subr.msk.mxu0 %vm318_vm0, %v294_v18  ;;  %v266_v43 = vld [vmem:[%s1096_s4] sm:$0xff] }
  0x2a   : >> { %785 = vmatpush3.xpose.msk.msra.mxu0 %vm318_vm0, %v278_v19  ;;  %v529_v19 = vlaneseq }
  0x2b   : >> { %786 = vmatprep.subr.msk.mxu0 %vm318_vm0, %v293_v20 }
  0x2c   : >> { %v530_v20 = vshrl.u32 %v529_v19, 7  ;;  %vm640_vm3 = vcmp.lt.s32.totalorder %v529_v19, 256 }
  0x2e   : >> { %787 = vmatpush3.xpose.msk.msra.mxu0 %vm318_vm0, %v277_v21  ;;  %v531_v21 = vsub.s32 0, %v530_v20 }
  0x2f   : >> { %788 = vmatprep.subr.msk.mxu0 %vm318_vm0, %v292_v22 }
  0x32   : >> { %789 = vmatpush3.xpose.msk.msra.mxu0 %vm318_vm0, %v276_v23  ;;  %v942_v23 = vmov 1966171168  }
  0x33   : >> { %790 = vmatprep.subr.msk.mxu0 %vm318_vm0, %v291_v24  ;;  %v621_v24 = vunpack.c.l.s4 %v942_v23 }
  0x36   : >> { %791 = vmatpush3.xpose.msk.msra.mxu0 %vm318_vm0, %v275_v25 }
  0x37   : >> { %792 = vmatprep.subr.msk.mxu0 %vm318_vm0, %v290_v26 }
  0x3a   : >> { %793 = vmatpush3.xpose.msk.msra.mxu0 %vm318_vm0, %v274_v27  ;;  %v622_v27 = vunpack.c.0.s8 %v621_v24 }
  0x3b   : >> { %794 = vmatprep.subr.msk.mxu0 %vm318_vm0, %v289_v28 }
  0x3e   : >> { %795 = vmatpush3.xpose.msk.msra.mxu0 %vm318_vm0, %v273_v29 }
  0x3f   : >> { %796 = vmatprep.subr.msk.mxu0 %vm318_vm0, %v288_v30 }
  0x42   : >> { %797 = vmatpush3.xpose.msk.msra.mxu0 %vm318_vm0, %v272_v31  ;;  %v625_v31 = vsub.s32 %v622_v27, %v530_v20 }
  0x43   : >> { %798 = vmatprep.subr.msk.mxu0 %vm318_vm0, %v287_v32 }
  0x46   : >> { %799 = vmatpush3.xpose.msk.msra.mxu0 %vm318_vm0, %v271_v33 }
  0x47   : >> { %800 = vmatprep.subr.msk.mxu0 %vm318_vm0, %v286_v34 }
  0x4a   : >> { %801 = vmatpush3.xpose.msk.msra.mxu0 %vm318_vm0, %v270_v35 }
  0x4b   : >> { %802 = vmatprep.subr.msk.mxu0 %vm318_vm0, %v285_v36 }
  0x4e   : >> { %803 = vmatpush3.xpose.msk.msra.mxu0 %vm318_vm0, %v269_v37 }
  0x4f   : >> { %804 = vmatprep.subr.msk.mxu0 %vm318_vm0, %v284_v38 }
  0x52   : >> { %805 = vmatpush3.xpose.msk.msra.mxu0 %vm318_vm0, %v268_v39 }
  0x53   : >> { %806 = vmatprep.subr.msk.mxu0 %vm318_vm0, %v283_v40 }
  0x56   : >> { %807 = vmatpush3.xpose.msk.msra.mxu0 %vm318_vm0, %v267_v41 }
  0x57   : >> { %808 = vmatprep.subr.msk.mxu0 %vm318_vm0, %v282_v42 }
  0x5a   : >> { %809 = vmatpush3.xpose.msk.msra.mxu0 %vm318_vm0, %v266_v43 }
  0x5d   : >> { %811 = vmatmul.mubr.msk.f32.vlgmr.msra.gmra.mxu0 %vm318_vm0, %v1028_v1 }
  0x5e   : >> { %812 = vmatprep.mubr.msk.f32.mxu0 %vm318_vm0, %v1033_v2 }
  0x61   : >> { %813 = vmatmul.mubr.msk.f32.gmra.mxu0 %vm318_vm0, %v1033_v2 }
  0x62   : >> { %814 = vmatprep.mubr.msk.f32.mxu0 %vm318_vm0, %v1038_v3 }
  0x65   : >> { %815 = vmatmul.mubr.msk.f32.gmra.mxu0 %vm318_vm0, %v1038_v3 }
  0x66   : >> { %816 = vmatprep.mubr.msk.f32.mxu0 %vm318_vm0, %v1048_v4 }
  0x69   : >> { %817 = vmatmul.mubr.msk.f32.gmra.mxu0 %vm318_vm0, %v1048_v4 }
  0x97   : >> { %v306_v52 = vpop.permute.xlu1 %305 }
  0x98   : >> { %v316_v49 = vpop.permute.xlu0 %315 }
  0x9b   : >> { %v301_v60 = vpop.permute.xlu1 %300 }
  0x9c   : >> { %v311_v54 = vpop.permute.xlu0 %310 }
  0xa0   : >> { %v527_v22 = vpop.permute.xlu0 %526 }
  0xa1   : >> { %v532_v25 = vrot.slane %v527_v22, %v531_v21 }
 0x11d   : >> { %v493_v45 = vpop.f32.mrf.mxu0 }
 0x11e   : >> { %v494_v13 = vadd.f32 %v493_v45, %v301_v60 }
 0x11f   : >> { %v495_v46 = vpop.f32.mrf.mxu0 }
 0x120   : >> { %v496_v11 = vadd.f32 %v495_v46, %v301_v60  ;;  %v516_v18 = vmax.f32 %v494_v13, 0.0 }
 0x121   : >> { %v499_v47 = vpop.f32.mrf.mxu0 }
 0x122   : >> { %v500_v63 = vadd.f32 %v499_v47, %v306_v52  ;;  %v517_v17 = vmax.f32 %v496_v11, 0.0 }
 0x123   : >> { %v501_v48 = vpop.f32.mrf.mxu0 }
 0x124   : >> { %v502_v61 = vadd.f32 %v501_v48, %v306_v52  ;;  %v518_v16 = vmax.f32 %v500_v63, 0.0 }
 0x125   : >> { %v505_v50 = vpop.f32.mrf.mxu0 }
 0x126   : >> { %v506_v59 = vadd.f32 %v505_v50, %v311_v54  ;;  %v519_v15 = vmax.f32 %v502_v61, 0.0 }
 0x127   : >> { %v507_v51 = vpop.f32.mrf.mxu0 }
 0x128   : >> { %v508_v57 = vadd.f32 %v507_v51, %v311_v54  ;;  %v520_v14 = vmax.f32 %v506_v59, 0.0 }
 0x129   : >> { %v511_v53 = vpop.f32.mrf.mxu0 }
 0x12a   : >> { %v512_v55 = vadd.f32 %v511_v53, %v316_v49  ;;  %v521_v12 = vmax.f32 %v508_v57, 0.0 }
 0x12b   : >> { %v513_v56 = vpop.f32.mrf.mxu0 }
 0x12c   : >> { %v514_v58 = vadd.f32 %v513_v56, %v316_v49  ;;  %v522_v0 = vmax.f32 %v512_v55, 0.0 }
 0x12e   : >> { %v523_v62 = vmax.f32 %v514_v58, 0.0 }
 0x130   : >> { %769 = vmatprep.subr.msk.mxu1 %vm537_vm1, %v523_v62 }
 0x131   : >> { %770 = vmatpush1.msk.msra.mxu1 %vm537_vm1, %v522_v0 }
 0x132   : >> { %570 = vmatprep.subr.mxu1 %v521_v12 }
 0x133   : >> { %571 = vmatpush1.msra.mxu1 %v520_v14 }
 0x134   : >> { %572 = vmatprep.subr.mxu1 %v519_v15 }
 0x135   : >> { %573 = vmatpush1.msra.mxu1 %v518_v16 }
 0x136   : >> { %574 = vmatprep.subr.mxu1 %v517_v17 }
 0x137   : >> { %575 = vmatpush1.msra.mxu1 %v516_v18 }
 0x138   : >> { %771 = vmatmul.mubr.msk.f32.vlgmr.msra.gmra.mxu1 %vm533_vm2, %v1073_v9 }
 0x1f8   : >> { %v610_v26 = vpop.f32.mrf.mxu1 }
 0x1f9   : >> { %v611_v28 = vadd.f32 %v610_v26, %v532_v25 }
 0x1fa   : >> { %v612_v29 = vpop.f32.mrf.mxu1 }
 0x1fb   : >> { %v613_v30 = vadd.f32 %v612_v29, %v532_v25  ;;  %v615_v32 = vmax.f32 %v611_v28, 0.0 }
 0x1fd   : >> { %v616_v33 = vmax.f32 %v613_v30, 0.0 }
 0x1ff   : >> { %v619_v34 = vcombine.low %v615_v32, %v616_v33 }
 0x201   : >> { %v626_v35 = vrot.slane %v619_v34, %v625_v31  ;;  %262 = sbr.rel (!%p260_p11) target bundleno = 26 (0x1a), region = 84 }
 0x203   : >> { %v633_v36 = vrot.slane %v626_v35, %v625_v31 }
 0x205   : >> { %642 = vst.msk [vmem:[%s637_s26] sm:$0x3] %vm640_vm3, %v633_v36 }
 0x206   : > { %883 = shalt.err (!%p880_p4)
}
 0x207   : > { %s884_s7 = scalar_lea.hbm %s656_s9, 64  ;;  %s888_s17 = scalar_lea.hbm %s1230_s5, 128 }
 0x208   : > { %p885_p7 = scmp.ne.s32.totalorder %s656_s9, %s884_s7  ;;  %p889_p10 = scmp.lt.s32.totalorder %s656_s9, %s1230_s5 }
 0x209   : > { %p890_p11 = scmp.lt.s32.totalorder %s888_s17, %s884_s7 }
 0x20a   : > { %p886_p8 = pnand %p885_p7, %p1012_p5 }
 0x20b   : > { %p891_p12 = por %p890_p11, %p889_p10 }
 0x20c   : > { %p887_p9 = pneg %p886_p8 }
 0x20e   : > { %p892_p13 = pnand %p891_p12, %p887_p9 }
 0x210   : > { %895 = shalt.err (!%p892_p13)
}
 0x211   : > { %818 = dma.vmem_to_hbm [thread:$0]  (%p1012_p5), %s659_s10, 64, %s656_s9, %s644_s11  }
 0x212 PF: > { %p824_p0 = scmp.ge.s32.totalorder %s934_s23, 2  ;;  %s670_s4 = sand.u32 1, %s922_s20  }
 0x213   : > { %s671_s24 = scalar_lea.sflag [#allocation4], %s670_s4 }
 0x214   : > { %p821_p1 = pnand %p824_p0, %p1016_p6 }
 0x216   : > { %p822_p2 = pneg %p821_p1 }
 0x218   : > { %917 = dma.done.wait (%p822_p2), %s671_s24, 64  }
 0x219   : > { %919 = vsyncadd (%p822_p2), %s671_s24, 4294967232  ;;  %p17_p3 = scmp.ge.s32.totalorder %s1000_s25, 4   ;;  %s1233_s20 = smov %s926_s21 }
 0x21a   : > { %s1234_s21 = smov %s930_s22  ;;  %s1235_s22 = smov %s1010_s28 }
 0x21b   : > { %s1236_s23 = smov %s1000_s25  ;;  %19 = sbr.rel (!%p17_p3) target bundleno = 6 (0x6), region = 95 }
 0x220   :  { %676 = vsyncpa [#allocation4], 1 }
 0x221   :  { %678 = vsyncpa [#allocation4 + $0x1], 1 }

</bundles_post_ra>
